<compile_context>
chip_gen: v7x
topology: tpu7x:2x2x1
jax: 0.10.0
libtpu: 0.0.40
codegen_flags: <defaults>
</compile_context>

<pallas_src>
import functools

import jax
import jax.numpy as jnp
from jax.experimental import pallas as pl
from jax.experimental.pallas import tpu as pltpu

ALPHA = 1.0
GAMMA = 2                 # integer power -> plain multiplies
MAX_TILE_ROWS = 1024      # 1024 x 384 f32 = 1.5 MiB per input block
TARGET_BLOCKS = 8         # aim for >= ~8 grid steps (pipelining + 2-TC balance)


def _round_up(a, m):
    return ((a + m - 1) // m) * m


def _focal_bce_partial_kernel(x_ref, t_ref, w_ref, out_ref, *,
                              tile_rows, lanes, n_rows, ragged_last_block):
    """One grid step: weighted BCE over a (tile_rows, lanes) block, tree-folded
    to an (8, 128) partial sum.  Row masking only on the (statically known)
    ragged last block."""
    x = x_ref[...].astype(jnp.float32)           # (tile_rows, lanes)
    t = t_ref[...].astype(jnp.float32)           # (tile_rows, lanes)
    w = w_ref[...].astype(jnp.float32)           # (1, lanes) -> broadcasts

    # Numerically-stable binary_cross_entropy_with_logits (elementwise).
    # NOTE: kept as log(1 + exp(-|x|)) (proven Mosaic lowering); it differs from
    # log1p only for |x| > ~16.6 and by < 6e-8 absolute -- benign under 'mean'.
    bce = jnp.maximum(x, 0.0) - x * t + jnp.log(1.0 + jnp.exp(-jnp.abs(x)))
    contrib = w * bce                            # (tile_rows, lanes)

    def fold(v):
        # Fold the lanes//128 lane groups with static aligned slices.
        acc = v[:, 0:128]
        for g in range(1, lanes // 128):
            acc = acc + v[:, g * 128:(g + 1) * 128]
        # Tree-reduce the sublane dimension (log-depth chain, sublane-aligned
        # static slices) down to (8, 128).
        r = tile_rows
        while r > 8 and r % 16 == 0:
            h = r // 2
            acc = acc[:h, :] + acc[h:, :]
            r = h
        if r > 8:
            acc = acc.reshape(r // 8, 8, 128).sum(axis=0)
        return acc

    if not ragged_last_block:
        # Static fast path: every block is fully valid, no mask work at all.
        out_ref[...] = fold(contrib)[None]
    else:
        i = pl.program_id(0)
        last = pl.num_programs(0) - 1

        @pl.when(i != last)
        def _():
            out_ref[...] = fold(contrib)[None]

        @pl.when(i == last)
        def _():
            # Cheap row-level mask for the padded edge block: a (tile_rows, 1)
            # iota compare, broadcast over lanes by jnp.where.  where() selects
            # 0.0 even if the garbage rows produced inf/NaN.
            row = jax.lax.broadcasted_iota(jnp.int32, (tile_rows, 1), 0)
            valid = (i * tile_rows + row) < n_rows
            out_ref[...] = fold(jnp.where(valid, contrib, 0.0))[None]


def focal_loss(inputs, targets, weight, *, alpha=ALPHA, gamma=GAMMA):
    """inputs, targets: (B, T, C) float (any float dtype); weight: (C,) float.
    Returns scalar float32 focal loss (reduction='mean')."""
    n_valid = int(inputs.size)                   # true element count B*T*C
    C = int(weight.shape[0])
    lanes = 128 * C                              # multiple of 128 and of C
    w32 = weight.astype(jnp.float32)

    n_rows = n_valid // lanes                    # whole lane-dense rows
    n_main = n_rows * lanes
    tail_len = n_valid - n_main                  # < lanes (< 384 for C=3)

    total = jnp.float32(0.0)

    if n_rows > 0:
        if tail_len == 0:
            # Zero-copy: pure reshape / bitcast of the operands in HBM.
            x2 = inputs.reshape(n_rows, lanes)
            t2 = targets.reshape(n_rows, lanes)
        else:
            # Ragged element count: run the kernel on the exact multiple-of-
            # lanes prefix; the tiny tail is folded in plain JAX below.
            # TODO(synk): for very large ragged inputs, switch to
            # memory_space=pl.ANY + manual in-kernel DMA to avoid this slice.
            x2 = inputs.reshape(-1)[:n_main].reshape(n_rows, lanes)
            t2 = targets.reshape(-1)[:n_main].reshape(n_rows, lanes)

        # Tile sizing: multiple of 32 rows (narrow-dtype-safe native tiles),
        # <= MAX_TILE_ROWS, and sized so we get ~TARGET_BLOCKS grid steps.
        tile_rows = _round_up(pl.cdiv(n_rows, TARGET_BLOCKS), 32)
        tile_rows = max(32, min(MAX_TILE_ROWS, tile_rows, _round_up(n_rows, 32)))
        n_blocks = pl.cdiv(n_rows, tile_rows)
        ragged_last_block = (n_rows % tile_rows) != 0

        # Per-lane class weights: weight[lane % C], tiny and resident in VMEM.
        w_row = jnp.tile(w32, lanes // C).reshape(1, lanes)

        kernel = functools.partial(
            _focal_bce_partial_kernel,
            tile_rows=tile_rows, lanes=lanes, n_rows=n_rows,
            ragged_last_block=ragged_last_block)

        partials = pl.pallas_call(
            kernel,
            out_shape=jax.ShapeDtypeStruct((n_blocks, 8, 128), jnp.float32),
            grid_spec=pltpu.PrefetchScalarGridSpec(
                num_scalar_prefetch=0,
                grid=(n_blocks,),
                in_specs=[
                    pl.BlockSpec((tile_rows, lanes), lambda i: (i, 0)),  # logits
                    pl.BlockSpec((tile_rows, lanes), lambda i: (i, 0)),  # targets
                    pl.BlockSpec((1, lanes), lambda i: (0, 0)),          # lane weights
                ],
                out_specs=pl.BlockSpec((1, 8, 128), lambda i: (i, 0, 0)),
            ),
            compiler_params=pltpu.CompilerParams(
                dimension_semantics=("parallel",),    # independent blocks -> megacore
                vmem_limit_bytes=32 * 1024 * 1024,    # headroom; actual use << limit
            ),
        )(x2, t2, w_row)

        total = total + jnp.sum(partials, dtype=jnp.float32)

    if tail_len > 0:
        # < lanes (< 384) elements: handle directly in JAX (negligible cost).
        tx = inputs.reshape(-1)[n_main:].astype(jnp.float32)
        tt = targets.reshape(-1)[n_main:].astype(jnp.float32)
        reps = (tail_len + C - 1) // C
        tw = jnp.tile(w32, reps)[:tail_len]      # class of elem k is k % C
        tbce = jnp.maximum(tx, 0.0) - tx * tt + jnp.log1p(jnp.exp(-jnp.abs(tx)))
        total = total + jnp.sum(tw * tbce, dtype=jnp.float32)

    # Tiny scalar epilogue: mean of weighted BCE + focal transform.
    bce_mean = total / jnp.float32(n_valid)
    pt = jnp.exp(-bce_mean)
    return (alpha * (1.0 - pt) ** gamma * bce_mean).astype(jnp.float32)


def _reference_focal_loss(inputs, targets, weight, alpha=ALPHA, gamma=GAMMA):
    x = inputs.astype(jnp.float32)
    t = targets.astype(jnp.float32)
    bce = jnp.maximum(x, 0.0) - x * t + jnp.log1p(jnp.exp(-jnp.abs(x)))
    bce_mean = jnp.mean(weight.astype(jnp.float32) * bce)
    pt = jnp.exp(-bce_mean)
    return alpha * (1.0 - pt) ** gamma * bce_mean


if __name__ == "__main__":
    key = jax.random.PRNGKey(0)
    weight = jnp.array([1.0, 5.0, 5.0], dtype=jnp.float32)   # num_classes = 3

    # (2,2048,3): zero-copy fast path, single exact block
    # (3, 500,3): ragged element count -> kernel prefix + JAX tail, masked edge block
    # (256,520,3): zero-copy multi-block grid with ragged last block
    # (2,   8,3): tiny input -> pure-JAX fallback (fewer elements than one row)
    for (B, T, C) in [(2, 2048, 3), (3, 500, 3), (256, 520, 3), (2, 8, 3)]:
        key, k_x, k_t = jax.random.split(key, 3)
        inputs = jax.random.normal(k_x, (B, T, C), dtype=jnp.float32)
        targets = jnp.round(jax.random.uniform(k_t, (B, T, C))).astype(jnp.float32)

        loss = focal_loss(inputs, targets, weight)
        jax.block_until_ready(loss)

        ref = _reference_focal_loss(inputs, targets, weight)
        assert jnp.allclose(loss, ref, rtol=1e-5, atol=1e-6), (B, T, C, loss, ref)

    print("KERNEL_OK")
</pallas_src>

<mosaic_0001>
module attributes {stable_mosaic.version = 11 : i64} {
  func.func @_focal_bce_partial_kernel(%arg0: i32, %arg1: memref<32x384xf32, #tpu.memory_space<vmem>>, %arg2: memref<32x384xf32, #tpu.memory_space<vmem>>, %arg3: memref<1x384xf32, #tpu.memory_space<vmem>>, %arg4: memref<1x8x128xf32, #tpu.memory_space<vmem>>) attributes {dimension_semantics = [#tpu.dimension_semantics<parallel>], iteration_bounds = array<i64: 1>, scalar_prefetch = 0 : i64, scratch_operands = 0 : i64, tpu.core_type = #tpu.core_type<tc>, window_params = [{transform_indices = @transform_0, window_bounds = array<i64: 32, 384>}, {transform_indices = @transform_1, window_bounds = array<i64: 32, 384>}, {pipeline_mode = #tpu.pipeline_mode<synchronous>, transform_indices = @transform_2, window_bounds = array<i64: 1, 384>}, {transform_indices = @transform_3, window_bounds = array<i64: 1, 8, 128>}]} {
    %c0 = arith.constant 0 : index
    %c0_0 = arith.constant 0 : index
    %0 = vector.load %arg1[%c0, %c0_0] : memref<32x384xf32, #tpu.memory_space<vmem>>, vector<32x384xf32>
    %c0_1 = arith.constant 0 : index
    %c0_2 = arith.constant 0 : index
    %1 = vector.load %arg2[%c0_1, %c0_2] : memref<32x384xf32, #tpu.memory_space<vmem>>, vector<32x384xf32>
    %c0_3 = arith.constant 0 : index
    %c0_4 = arith.constant 0 : index
    %2 = vector.load %arg3[%c0_3, %c0_4] : memref<1x384xf32, #tpu.memory_space<vmem>>, vector<1x384xf32>
    %cst = arith.constant 0.000000e+00 : f32
    %3 = vector.broadcast %cst : f32 to vector<32x384xf32>
    %4 = arith.maximumf %0, %3 : vector<32x384xf32>
    %5 = arith.mulf %0, %1 : vector<32x384xf32>
    %6 = arith.subf %4, %5 : vector<32x384xf32>
    %7 = math.absf %0 : vector<32x384xf32>
    %cst_5 = arith.constant 0.000000e+00 : f32
    %8 = vector.broadcast %cst_5 : f32 to vector<32x384xf32>
    %9 = arith.subf %8, %7 : vector<32x384xf32>
    %10 = math.exp %9 : vector<32x384xf32>
    %cst_6 = arith.constant 1.000000e+00 : f32
    %11 = vector.broadcast %cst_6 : f32 to vector<32x384xf32>
    %12 = arith.addf %11, %10 : vector<32x384xf32>
    %13 = math.log %12 : vector<32x384xf32>
    %14 = arith.addf %6, %13 : vector<32x384xf32>
    %15 = vector.broadcast %2 : vector<1x384xf32> to vector<32x384xf32>
    %16 = arith.mulf %15, %14 : vector<32x384xf32>
    %17 = vector.extract_strided_slice %16 {offsets = [0, 0], sizes = [32, 128], strides = [1, 1]} : vector<32x384xf32> to vector<32x128xf32>
    %18 = vector.extract_strided_slice %16 {offsets = [0, 128], sizes = [32, 128], strides = [1, 1]} : vector<32x384xf32> to vector<32x128xf32>
    %19 = arith.addf %17, %18 : vector<32x128xf32>
    %20 = vector.extract_strided_slice %16 {offsets = [0, 256], sizes = [32, 128], strides = [1, 1]} : vector<32x384xf32> to vector<32x128xf32>
    %21 = arith.addf %19, %20 : vector<32x128xf32>
    %22 = vector.extract_strided_slice %21 {offsets = [0, 0], sizes = [16, 128], strides = [1, 1]} : vector<32x128xf32> to vector<16x128xf32>
    %23 = vector.extract_strided_slice %21 {offsets = [16, 0], sizes = [16, 128], strides = [1, 1]} : vector<32x128xf32> to vector<16x128xf32>
    %24 = arith.addf %22, %23 : vector<16x128xf32>
    %25 = vector.extract_strided_slice %24 {offsets = [0, 0], sizes = [8, 128], strides = [1, 1]} : vector<16x128xf32> to vector<8x128xf32>
    %26 = vector.extract_strided_slice %24 {offsets = [8, 0], sizes = [8, 128], strides = [1, 1]} : vector<16x128xf32> to vector<8x128xf32>
    %27 = arith.addf %25, %26 : vector<8x128xf32>
    %28 = vector.shape_cast %27 : vector<8x128xf32> to vector<1x8x128xf32>
    %c0_7 = arith.constant 0 : index
    %c0_8 = arith.constant 0 : index
    %c0_9 = arith.constant 0 : index
    %29 = vector.load %arg4[%c0_7, %c0_8, %c0_9] : memref<1x8x128xf32, #tpu.memory_space<vmem>>, vector<1x8x128xf32>
    tpu.vector_store %arg4[%c0_7, %c0_8, %c0_9], %28 {strides = array<i32>} : memref<1x8x128xf32, #tpu.memory_space<vmem>>, vector<1x8x128xf32>,
    return
  }
  func.func @transform_0(%arg0: i32) -> (i32, i32) {
    %c0_i32 = arith.constant 0 : i32
    %c0_i32_0 = arith.constant 0 : i32
    return %arg0, %c0_i32 : i32, i32
  }
  func.func @transform_1(%arg0: i32) -> (i32, i32) {
    %c0_i32 = arith.constant 0 : i32
    %c0_i32_0 = arith.constant 0 : i32
    return %arg0, %c0_i32 : i32, i32
  }
  func.func @transform_2(%arg0: i32) -> (i32, i32) {
    %c0_i32 = arith.constant 0 : i32
    %c0_i32_0 = arith.constant 0 : i32
    %c0_i32_1 = arith.constant 0 : i32
    return %c0_i32, %c0_i32_0 : i32, i32
  }
  func.func @transform_3(%arg0: i32) -> (i32, i32, i32) {
    %c0_i32 = arith.constant 0 : i32
    %c0_i32_0 = arith.constant 0 : i32
    %c0_i32_1 = arith.constant 0 : i32
    return %arg0, %c0_i32, %c0_i32_0 : i32, i32, i32
  }
}

</mosaic_0001>

<bundles_post_ra>
// kernel: tpu_custom_call.1
= control target key start
LH: loop header
LB: loop body
LE: loop exit
PB: predicated region body
PF: predicated region fallthrough
CT: control target
= control target key end

     0   :  { %8 = vsyncpa [#allocation3], 0  ;;  %s536_s0 = inlined_call_operand.hbm [shape: f32[32,384], index: 0, kind: input, shape index: {}]   ;;  %s537_s1 = inlined_call_operand.hbm [shape: f32[32,384], index: 1, kind: input, shape index: {}]   ;;  %s538_s2 = inlined_call_operand.vmem [shape: f32[1,384], index: 2, kind: input, shape index: {}]   ;;  %s539_s3 = inlined_call_operand.hbm [shape: f32[1,8,128], index: 3, kind: output, shape index: {}]  }
   0x1   :  { %9 = vsyncpa [#allocation6], 0 }
   0x2   :  { %10 = vsyncpa [#allocation4], 0  ;;  %s381_s12 = smov [#allocation2]   ;;  %s309_s16 = scalar_lea.hbm %s536_s0, 1536 }
   0x3   :  { %s16_s13 = sshll.u32 %s381_s12, 4  ;;  %p310_p0 = scmp.ne.s32.totalorder %s536_s0, %s309_s16  ;;  %s17_s13 = int_to_ptr.vmem [resolvable:$true] %s16_s13 }
   0x4   :  { %p313_p1 = scmp.lt.u32.totalorder %s309_s16, %s536_s0 }
   0x6   :  { %p315_p2 = pnand %p313_p1, %p310_p0 }
   0x8   :  { %318 = shalt.err (!%p315_p2)
}
   0x9   :  { %s319_s21 = scalar_lea.vmem %s17_s13, 1536  ;;  %p324_p4 = scmp.lt.s32.totalorder %s17_s13, %s17_s13 }
   0xa   :  { %p320_p3 = scmp.ne.s32.totalorder %s17_s13, %s319_s21  ;;  %p325_p5 = scmp.lt.s32.totalorder %s319_s21, %s319_s21 }
   0xc   :  { %p326_p6 = por %p325_p5, %p324_p4 }
   0xe   :  { %p327_p7 = pnand %p326_p6, %p320_p3 }
  0x10   :  { %330 = shalt.err (!%p327_p7)
}
  0x11   :  { %s382_s22 = smov 384   ;;  %s383_s23 = smov 24  }
  0x12   :  { %22 = dma.hbm_to_vmem [thread:$0]  %s536_s0, 1536, %s17_s13, [#allocation3], %s382_s22, %s382_s22, %s383_s23  }
  0x13   :  { %s384_s26 = smov [#allocation5]   ;;  %s331_s30 = scalar_lea.hbm %s537_s1, 1536 }
  0x14   :  { %s28_s27 = sshll.u32 %s384_s26, 4  ;;  %p332_p8 = scmp.ne.s32.totalorder %s537_s1, %s331_s30  ;;  %s29_s27 = int_to_ptr.vmem [resolvable:$true] %s28_s27 }
  0x15   :  { %p335_p9 = scmp.lt.u32.totalorder %s331_s30, %s537_s1 }
  0x17   :  { %p337_p10 = pnand %p335_p9, %p332_p8 }
  0x19   :  { %340 = shalt.err (!%p337_p10)
}
  0x1a   :  { %s341_s8 = scalar_lea.vmem %s29_s27, 1536  ;;  %p346_p12 = scmp.lt.s32.totalorder %s29_s27, %s29_s27 }
  0x1b   :  { %p342_p11 = scmp.ne.s32.totalorder %s29_s27, %s341_s8  ;;  %p347_p13 = scmp.lt.s32.totalorder %s341_s8, %s341_s8 }
  0x1d   :  { %p348_p0 = por %p347_p13, %p346_p12 }
  0x1f   :  { %p349_p1 = pnand %p348_p0, %p342_p11 }
  0x21   :  { %352 = shalt.err (!%p349_p1)
}
  0x22   :  { %34 = dma.hbm_to_vmem [thread:$0]  %s537_s1, 1536, %s29_s27, [#allocation6], %s382_s22, %s382_s22, %s383_s23  }
  0x23   :  { %375 = dma.done.wait [#allocation3], 1536  }
  0x24   :  { %376 = vsyncadd [#allocation3], 4294965760 }
  0x25   :  { %377 = dma.done.wait [#allocation6], 1536  }
  0x26   :  { %378 = vsyncadd [#allocation6], 4294965760  ;;  %v430_v0 = vld [vmem:[#allocation2] sm:$0xff]  ;;  %v432_v1 = vld [vmem:[#allocation2 + $0x8] sm:$0xff]  ;;  %v201_v45 = vlaneseq }
  0x27   :  { %v434_v2 = vld [vmem:[#allocation2 + $0x10] sm:$0xff]  ;;  %v436_v3 = vld [vmem:[#allocation2 + $0x18] sm:$0xff]  ;;  %v438_v4 = vld [vmem:[#allocation2 + $0x20] sm:$0xff]  ;;  %v104_v7 = vand.u32 2147483647, %v430_v0  ;;  %v68_v59 = vmax.f32 %v430_v0, 0.0 }
  0x28   :  { %v440_v5 = vld [vmem:[#allocation2 + $0x28] sm:$0xff]  ;;  %v442_v6 = vld [vmem:[#allocation2 + $0x30] sm:$0xff]  ;;  %v105_v8 = vand.u32 2147483647, %v432_v1  ;;  %v446_v9 = vld [vmem:[#allocation2 + $0x38] sm:$0xff]  ;;  %v466_v49 = vshrl.u32 %v201_v45, 7 }
  0x29   :  { %v448_v10 = vld [vmem:[#allocation2 + $0x40] sm:$0xff]  ;;  %v106_v11 = vand.u32 2147483647, %v434_v2  ;;  %v107_v12 = vand.u32 2147483647, %v436_v3  ;;  %v452_v13 = vld [vmem:[#allocation2 + $0x48] sm:$0xff] }
  0x2a   :  { %v108_v14 = vand.u32 2147483647, %v438_v4  ;;  %v109_v15 = vand.u32 2147483647, %v440_v5  ;;  %v456_v16 = vld [vmem:[#allocation2 + $0x50] sm:$0xff]  ;;  %v458_v17 = vld [vmem:[#allocation2 + $0x58] sm:$0xff] }
  0x2b   :  { %v110_v18 = vand.u32 2147483647, %v442_v6  ;;  %v111_v19 = vand.u32 2147483647, %v446_v9  ;;  %v112_v20 = vand.u32 2147483647, %v448_v10 }
  0x2c   :  { %v116_v21 = vsub.f32 0.0, %v104_v7  ;;  %v117_v22 = vsub.f32 0.0, %v105_v8  ;;  %v113_v23 = vand.u32 2147483647, %v452_v13  ;;  %v118_v24 = vsub.f32 0.0, %v106_v11 }
  0x2d   :  { %v119_v25 = vsub.f32 0.0, %v107_v12  ;;  %v120_v26 = vsub.f32 0.0, %v108_v14  ;;  %v114_v27 = vand.u32 2147483647, %v456_v16  ;;  %v115_v28 = vand.u32 2147483647, %v458_v17 }
  0x2e   :  { %v121_v29 = vsub.f32 0.0, %v109_v15  ;;  %v122_v30 = vsub.f32 0.0, %v110_v18  ;;  %v128_v31 = vmul.f32 1.442695, %v116_v21  ;;  %v130_v32 = vmul.f32 1.442695, %v117_v22 }
  0x2f   :  { %v123_v33 = vsub.f32 0.0, %v111_v19  ;;  %v132_v34 = vmul.f32 1.442695, %v118_v24  ;;  %v134_v35 = vmul.f32 1.442695, %v119_v25  ;;  %v124_v36 = vsub.f32 0.0, %v112_v20 }
  0x30   :  { %261 = vpow2.f32 %v128_v31  ;;  %v136_v37 = vmul.f32 1.442695, %v120_v26  ;;  %v125_v38 = vsub.f32 0.0, %v113_v23  ;;  %v138_v39 = vmul.f32 1.442695, %v121_v29  ;;  %v55_v12 = vld [vmem:[#allocation5] sm:$0xff] }
  0x31   :  { %263 = vpow2.f32 %v130_v32  ;;  %v126_v40 = vsub.f32 0.0, %v114_v27  ;;  %v140_v41 = vmul.f32 1.442695, %v122_v30  ;;  %v127_v42 = vsub.f32 0.0, %v115_v28  ;;  %v56_v20 = vld [vmem:[#allocation5 + $0x8] sm:$0xff]  ;;  %v57_v25 = vld [vmem:[#allocation5 + $0x10] sm:$0xff] }
  0x32   :  { %265 = vpow2.f32 %v132_v34  ;;  %v142_v43 = vmul.f32 1.442695, %v123_v33  ;;  %v144_v44 = vmul.f32 1.442695, %v124_v36  ;;  %v146_v46 = vmul.f32 1.442695, %v125_v38 }
  0x33   :  { %267 = vpow2.f32 %v134_v35  ;;  %v148_v47 = vmul.f32 1.442695, %v126_v40  ;;  %v150_v48 = vmul.f32 1.442695, %v127_v42  ;;  %v203_v55 = vsub.s32 0, %v466_v49  ;;  %v58_v26 = vld [vmem:[#allocation5 + $0x18] sm:$0xff] }
  0x34   :  { %269 = vpow2.f32 %v136_v37  ;;  %v207_v56 = vsub.s32 1, %v466_v49  ;;  %v211_v57 = vsub.s32 2, %v466_v49  ;;  %v69_v60 = vmax.f32 %v432_v1, 0.0  ;;  %v59_v31 = vld [vmem:[#allocation5 + $0x20] sm:$0xff]  ;;  %v60_v32 = vld [vmem:[#allocation5 + $0x28] sm:$0xff]  ;;  %v61_v37 = vld [vmem:[#allocation5 + $0x30] sm:$0xff] }
  0x35   :  { %271 = vpow2.f32 %v138_v39  ;;  %v70_v63 = vmax.f32 %v434_v2, 0.0  ;;  %v71_v7 = vmax.f32 %v436_v3, 0.0  ;;  %v72_v14 = vmax.f32 %v438_v4, 0.0  ;;  %v62_v42 = vld [vmem:[#allocation5 + $0x38] sm:$0xff] }
  0x36   :  { %273 = vpow2.f32 %v140_v41  ;;  %v73_v15 = vmax.f32 %v440_v5, 0.0  ;;  %v74_v21 = vmax.f32 %v442_v6, 0.0  ;;  %v75_v22 = vmax.f32 %v446_v9, 0.0 }
  0x37   :  { %275 = vpow2.f32 %v142_v43  ;;  %v76_v27 = vmax.f32 %v448_v10, 0.0  ;;  %v77_v28 = vmax.f32 %v452_v13, 0.0  ;;  %v78_v33 = vmax.f32 %v456_v16, 0.0  ;;  %v63_v43 = vld [vmem:[#allocation5 + $0x40] sm:$0xff] }
  0x38   :  { %277 = vpow2.f32 %v144_v44  ;;  %v80_v34 = vmul.f32 %v55_v12, %v430_v0  ;;  %v79_v38 = vmax.f32 %v458_v17, 0.0  ;;  %v81_v39 = vmul.f32 %v56_v20, %v432_v1 }
  0x39   :  { %279 = vpow2.f32 %v146_v46  ;;  %v82_v44 = vmul.f32 %v57_v25, %v434_v2  ;;  %v83_v45 = vmul.f32 %v58_v26, %v436_v3  ;;  %v86_v1 = vmul.f32 %v61_v37, %v442_v6 }
  0x3a   :  { %v262_v50 = vpop.eup %261  ;;  %281 = vpow2.f32 %v148_v47  ;;  %v64_v47 = vld [vmem:[#allocation5 + $0x48] sm:$0xff] }
  0x3b   :  { %v264_v51 = vpop.eup %263  ;;  %283 = vpow2.f32 %v150_v48  ;;  %v152_v52 = vadd.f32 1.0, %v262_v50  ;;  %v65_v48 = vld [vmem:[#allocation5 + $0x50] sm:$0xff]  ;;  %v84_v50 = vmul.f32 %v59_v31, %v438_v4  ;;  %v95_v25 = vsub.f32 %v71_v7, %v83_v45 }
  0x3c   :  { %v266_v53 = vpop.eup %265  ;;  %v153_v54 = vadd.f32 1.0, %v264_v51  ;;  %v85_v51 = vmul.f32 %v60_v32, %v440_v5  ;;  %v90_v20 = vmul.f32 %v65_v48, %v456_v16 }
  0x3d   :  { %v268_v58 = vpop.eup %267  ;;  %v154_v61 = vadd.f32 1.0, %v266_v53  ;;  %285 = vlog2.f32 %v152_v52  ;;  %v92_v53 = vsub.f32 %v68_v59, %v80_v34  ;;  %v96_v26 = vsub.f32 %v72_v14, %v84_v50 }
  0x3e   :  { %v270_v62 = vpop.eup %269  ;;  %v155_v8 = vadd.f32 1.0, %v268_v58  ;;  %287 = vlog2.f32 %v153_v54  ;;  %v97_v3 = vsub.f32 %v73_v15, %v85_v51  ;;  %v98_v14 = vsub.f32 %v74_v21, %v86_v1 }
  0x3f   :  { %v272_v11 = vpop.eup %271  ;;  %v156_v18 = vadd.f32 1.0, %v270_v62  ;;  %289 = vlog2.f32 %v154_v61  ;;  %v67_v61 = vld [vmem:[%s538_s2] sm:$0x7]  ;;  %v87_v62 = vmul.f32 %v62_v42, %v446_v9  ;;  %s385_s2 = smov [#allocation7]  }
  0x40   :  { %v274_v19 = vpop.eup %273  ;;  %v157_v23 = vadd.f32 1.0, %v272_v11  ;;  %291 = vlog2.f32 %v155_v8  ;;  %v88_v8 = vmul.f32 %v63_v43, %v448_v10  ;;  %v93_v11 = vsub.f32 %v69_v60, %v81_v39  ;;  %s246_s11 = sshll.u32 %s385_s2, 4  ;;  %s247_s11 = int_to_ptr.vmem [resolvable:$true] %s246_s11 }
  0x41   :  { %v276_v24 = vpop.eup %275  ;;  %v158_v29 = vadd.f32 1.0, %v274_v19  ;;  %293 = vlog2.f32 %v156_v18  ;;  %v66_v18 = vld [vmem:[#allocation5 + $0x58] sm:$0xff]  ;;  %v89_v19 = vmul.f32 %v64_v47, %v452_v13  ;;  %v204_v32 = vrot.slane %v67_v61, %v203_v55  ;;  %s353_s12 = scalar_lea.vmem %s247_s11, 128  ;;  %p358_p3 = scmp.lt.s32.totalorder %s247_s11, %s247_s11 }
  0x42   :  { %v278_v30 = vpop.eup %277  ;;  %v159_v35 = vadd.f32 1.0, %v276_v24  ;;  %295 = vlog2.f32 %v157_v23  ;;  %v94_v24 = vsub.f32 %v70_v63, %v82_v44  ;;  %v208_v34 = vrot.slane %v67_v61, %v207_v56  ;;  %p354_p2 = scmp.ne.s32.totalorder %s247_s11, %s353_s12  ;;  %p359_p4 = scmp.lt.s32.totalorder %s353_s12, %s353_s12 }
  0x43   :  { %v280_v36 = vpop.eup %279  ;;  %v160_v40 = vadd.f32 1.0, %v278_v30  ;;  %297 = vlog2.f32 %v158_v29  ;;  %v91_v2 = vmul.f32 %v66_v18, %v458_v17  ;;  %v100_v55 = vsub.f32 %v76_v27, %v88_v8 }
  0x44   :  { %v282_v41 = vpop.eup %281  ;;  %v161_v46 = vadd.f32 1.0, %v280_v36  ;;  %299 = vlog2.f32 %v159_v35  ;;  %v99_v36 = vsub.f32 %v75_v22, %v87_v62  ;;  %v212_v5 = vrot.slane %v67_v61, %v211_v57  ;;  %p360_p5 = por %p359_p4, %p358_p3 }
  0x45   :  { %v284_v0 = vpop.eup %283  ;;  %v162_v52 = vadd.f32 1.0, %v282_v41  ;;  %301 = vlog2.f32 %v160_v40  ;;  %v101_v9 = vsub.f32 %v77_v28, %v89_v19  ;;  %v102_v10 = vsub.f32 %v78_v33, %v90_v20 }
  0x46   :  { %v163_v54 = vadd.f32 1.0, %v284_v0  ;;  %303 = vlog2.f32 %v161_v46  ;;  %v103_v48 = vsub.f32 %v79_v38, %v91_v2  ;;  %p361_p6 = pnand %p360_p5, %p354_p2 }
  0x47   :  { %v286_v58 = vpop.eup %285  ;;  %305 = vlog2.f32 %v162_v52 }
  0x48   :  { %v288_v12 = vpop.eup %287  ;;  %v165_v59 = vmul.f32 0.6931472, %v286_v58  ;;  %307 = vlog2.f32 %v163_v54 }
  0x49   :  { %v290_v23 = vpop.eup %289  ;;  %v167_v60 = vmul.f32 0.6931472, %v288_v12 }
  0x4a   :  { %v292_v29 = vpop.eup %291  ;;  %v169_v30 = vmul.f32 0.6931472, %v290_v23  ;;  %v188_v31 = vadd.f32 %v165_v59, %v92_v53 }
  0x4b   :  { %v294_v35 = vpop.eup %293  ;;  %v171_v63 = vmul.f32 0.6931472, %v292_v29  ;;  %v189_v7 = vadd.f32 %v167_v60, %v93_v11 }
  0x4c   :  { %v296_v4 = vpop.eup %295  ;;  %v173_v37 = vmul.f32 0.6931472, %v294_v35  ;;  %v190_v40 = vadd.f32 %v169_v30, %v94_v24  ;;  %v216_v44 = vmul.f32 %v204_v32, %v188_v31 }
  0x4d   :  { %v298_v56 = vpop.eup %297  ;;  %v175_v39 = vmul.f32 0.6931472, %v296_v4  ;;  %v191_v41 = vadd.f32 %v171_v63, %v95_v25  ;;  %v217_v6 = vmul.f32 %v208_v34, %v189_v7 }
  0x4e   :  { %v300_v15 = vpop.eup %299  ;;  %v177_v42 = vmul.f32 0.6931472, %v298_v56  ;;  %v192_v43 = vadd.f32 %v173_v37, %v96_v26  ;;  %v218_v52 = vmul.f32 %v212_v5, %v190_v40 }
  0x4f   :  { %v302_v21 = vpop.eup %301  ;;  %v179_v22 = vmul.f32 0.6931472, %v300_v15  ;;  %v193_v27 = vadd.f32 %v175_v39, %v97_v3  ;;  %v219_v47 = vmul.f32 %v204_v32, %v191_v41  ;;  %v228_v16 = vadd.f32 %v217_v6, %v216_v44 }
  0x50   :  { %v304_v45 = vpop.eup %303  ;;  %v181_v46 = vmul.f32 0.6931472, %v302_v21  ;;  %v194_v0 = vadd.f32 %v177_v42, %v98_v14  ;;  %v220_v49 = vmul.f32 %v208_v34, %v192_v43 }
  0x51   :  { %v306_v57 = vpop.eup %305  ;;  %v183_v50 = vmul.f32 0.6931472, %v304_v45  ;;  %v195_v51 = vadd.f32 %v179_v22, %v99_v36  ;;  %v221_v62 = vmul.f32 %v212_v5, %v193_v27  ;;  %v232_v38 = vadd.f32 %v228_v16, %v218_v52 }
  0x52   :  { %v308_v1 = vpop.eup %307  ;;  %v185_v13 = vmul.f32 0.6931472, %v306_v57  ;;  %v196_v28 = vadd.f32 %v181_v46, %v100_v55  ;;  %v222_v53 = vmul.f32 %v204_v32, %v194_v0  ;;  %v229_v11 = vadd.f32 %v220_v49, %v219_v47 }
  0x53   :  { %v187_v33 = vmul.f32 0.6931472, %v308_v1  ;;  %v197_v54 = vadd.f32 %v183_v50, %v101_v9  ;;  %v223_v58 = vmul.f32 %v208_v34, %v195_v51 }
  0x54   :  { %v198_v61 = vadd.f32 %v185_v13, %v102_v10  ;;  %v224_v8 = vmul.f32 %v212_v5, %v196_v28  ;;  %v233_v24 = vadd.f32 %v229_v11, %v221_v62 }
  0x55   :  { %v199_v12 = vadd.f32 %v187_v33, %v103_v48  ;;  %v225_v18 = vmul.f32 %v204_v32, %v197_v54  ;;  %v230_v19 = vadd.f32 %v223_v58, %v222_v53 }
  0x56   :  { %v226_v17 = vmul.f32 %v208_v34, %v198_v61 }
  0x57   :  { %v227_v20 = vmul.f32 %v212_v5, %v199_v12  ;;  %v234_v59 = vadd.f32 %v230_v19, %v224_v8 }
  0x58   :  { %v231_v23 = vadd.f32 %v226_v17, %v225_v18 }
  0x59   :  { %v236_v26 = vadd.f32 %v234_v59, %v232_v38 }
  0x5a   :  { %v235_v25 = vadd.f32 %v231_v23, %v227_v20 }
  0x5c   :  { %v237_v60 = vadd.f32 %v235_v25, %v233_v24 }
  0x5e   :  { %v238_v29 = vadd.f32 %v237_v60, %v236_v26 }
  0x60   :  { %239 = vst [vmem:[#allocation7] sm:$0xff] %v238_v29 }
  0x61   :  { %364 = shalt.err (!%p361_p6)
}
  0x62   :  { %s365_s15 = scalar_lea.hbm %s539_s3, 128 }
  0x63   :  { %p366_p7 = scmp.ne.s32.totalorder %s539_s3, %s365_s15  ;;  %p369_p8 = scmp.lt.u32.totalorder %s365_s15, %s539_s3 }
  0x65   :  { %p371_p9 = pnand %p369_p8, %p366_p7 }
  0x67   :  { %374 = shalt.err (!%p371_p9)
}
  0x68   :  { %249 = dma.vmem_to_hbm [thread:$0]  %s247_s11, 128, %s539_s3, [#allocation4]  }
  0x69   :  { %379 = dma.done.wait [#allocation4], 128  }
  0x6a   :  { %380 = vsyncadd [#allocation4], 4294967168 }
  0x6b   :  { %253 = vsyncpa [#allocation3], 1 }
  0x6c   :  { %254 = vsyncpa [#allocation6], 1 }
  0x6d   :  { %255 = vsyncpa [#allocation4], 1 }

</bundles_post_ra>
